<compile_context>
chip_gen: v7x
topology: tpu7x:2x2x1
jax: 0.10.0
libtpu: 0.0.40
codegen_flags: <defaults>
</compile_context>

<pallas_src>
import math

import jax
import jax.numpy as jnp
from jax.experimental import pallas as pl
from jax.experimental.pallas import tpu as pltpu

_HAS_BUFFERED = hasattr(pl, "Buffered")
_INV_SQRT2 = 0.7071067811865476


def _round_up(a: int, b: int) -> int:
    return (a + b - 1) // b * b


def _vmem_capacity_bytes() -> int:
    try:
        return int(pltpu.get_tpu_info().vmem_capacity_bytes)
    except Exception:
        return 64 << 20  # conservative fallback: v7x per-TensorCore VMEM


def _erf_f32(x):
    """Abramowitz & Stegun 7.1.26 erf approximation, |err| <= 1.5e-7 (f32).

    Built only from primitives with guaranteed Mosaic lowerings; the exp goes
    to the EUP slot, keeping the VALU slot free for matmul-adjacent work.
    """
    a1, a2, a3, a4, a5 = (0.254829592, -0.284496736, 1.421413741,
                          -1.453152027, 1.061405429)
    p = 0.3275911
    ax = jnp.abs(x)
    t = 1.0 / (1.0 + p * ax)
    poly = ((((a5 * t + a4) * t + a3) * t + a2) * t + a1) * t
    y = 1.0 - poly * jnp.exp(-(ax * ax))
    return jnp.where(x < 0.0, -y, y)


def _gelu_exact(x):
    # Matches PyTorch nn.GELU() (erf form) to ~1e-7 absolute.
    return x * (0.5 * (1.0 + _erf_f32(x * _INV_SQRT2)))


def _mlp_kernel_resident(x_ref, w1_ref, b1_ref, w2_ref, b2_ref, o_ref):
    """Whole hidden dim resident in VMEM: one fused fc1->GELU->fc2 per M tile."""
    h = jnp.dot(x_ref[...], w1_ref[...], preferred_element_type=jnp.float32)
    h = _gelu_exact(h + b1_ref[...])
    out = jnp.dot(h.astype(w2_ref.dtype), w2_ref[...],
                  preferred_element_type=jnp.float32) + b2_ref[...]
    o_ref[...] = out.astype(o_ref.dtype)


def _mlp_kernel_tiled(x_ref, w1_ref, b1_ref, w2_ref, b2_ref, o_ref, acc_ref):
    """Hidden dim tiled (grid axis 1): accumulate fc2 contributions in f32 VMEM."""
    j = pl.program_id(1)

    @pl.when(j == 0)
    def _init():
        acc_ref[...] = jnp.zeros_like(acc_ref)

    h = jnp.dot(x_ref[...], w1_ref[...], preferred_element_type=jnp.float32)
    h = _gelu_exact(h + b1_ref[...])
    acc_ref[...] += jnp.dot(h.astype(w2_ref.dtype), w2_ref[...],
                            preferred_element_type=jnp.float32)

    @pl.when(j == pl.num_programs(1) - 1)
    def _finalize():
        o_ref[...] = (acc_ref[...] + b2_ref[...]).astype(o_ref.dtype)


def prepare_mlp_params(w1, b1, w2, b2, *, compute_dtype=jnp.bfloat16):
    """Pad/cast the parameters once (hoist out of the per-call path).

    w1: (C_in, H); b1: (H,); w2: (H, C_out); b2: (C_out,).  Weights are padded
    to 128-multiples on both axes and cast to compute_dtype; biases stay f32.
    """
    C_in, H = w1.shape
    assert w2.shape[0] == H
    C_out = w2.shape[1]

    C_in_p = _round_up(C_in, 128)
    C_out_p = _round_up(C_out, 128)
    H_p = _round_up(H, 128)

    def pad2(a, r, c):
        return a if a.shape == (r, c) else jnp.pad(
            a, ((0, r - a.shape[0]), (0, c - a.shape[1])))

    w1_p = pad2(w1, C_in_p, H_p).astype(compute_dtype)
    w2_p = pad2(w2, H_p, C_out_p).astype(compute_dtype)
    b1_p = (b1 if H_p == H else jnp.pad(b1, (0, H_p - H))
            ).astype(jnp.float32).reshape(1, H_p)
    b2_p = (b2 if C_out_p == C_out else jnp.pad(b2, (0, C_out_p - C_out))
            ).astype(jnp.float32).reshape(1, C_out_p)

    return {"w1": w1_p, "b1": b1_p, "w2": w2_p, "b2": b2_p,
            "dims": (C_in, H, C_out), "compute_dtype": jnp.dtype(compute_dtype)}


def mlp_layer_prepared(x, params, *, tm=None, th=None):
    """Forward pass with pre-padded params. x: (..., C_in) -> (..., C_out)."""
    w1_p, b1_p, w2_p, b2_p = params["w1"], params["b1"], params["w2"], params["b2"]
    C_in, H, C_out = params["dims"]
    compute_dtype = params["compute_dtype"]

    orig_dtype = x.dtype
    *lead, cx = x.shape
    assert cx == C_in, f"expected last dim {C_in}, got {cx}"
    M = math.prod(lead) if lead else 1

    C_in_p, H_p = w1_p.shape
    C_out_p = w2_p.shape[1]

    cb = jnp.dtype(compute_dtype).itemsize
    ob = jnp.dtype(orig_dtype).itemsize

    vmem_cap = _vmem_capacity_bytes()
    budget = int(0.70 * vmem_cap)
    if tm is None:
        tm = 512 if vmem_cap >= (96 << 20) else 256  # v5e/v6e: 128 MiB VMEM; v7x: 64 MiB
    if th is None:
        th = 512

    def need(TM, TH, n_wbuf):
        return (n_wbuf * (C_in_p * TH + TH * C_out_p) * cb  # w1/w2 tiles
                + n_wbuf * (TH + C_out_p) * 4               # b1/b2 (f32)
                + 2 * TM * C_in_p * cb                       # x tile (double-buffered)
                + 2 * TM * C_out_p * ob                      # out tile (double-buffered)
                + TM * C_out_p * 4                           # f32 accumulator
                + 2 * TM * TH * 4)                           # fc1 intermediate + GELU temps

    # --- token tile (sublane-aligned) ---
    TM = min(tm, _round_up(M, 8))
    if M > 8 and _round_up(M, TM) // TM < 2:
        # Guarantee >=2 M tiles so the "parallel" axis can shard across v7x's 2 TCs.
        TM = _round_up((M + 1) // 2, 8)

    # --- hidden tile: prefer fully VMEM-resident weights (H grid collapses, so
    #     every weight block is DMA'd from HBM exactly once for the whole call) ---
    n_wbuf_res = 1 if _HAS_BUFFERED else 2
    if need(TM, H_p, n_wbuf_res) <= budget:
        TH = H_p
    else:
        TH = 128
        cand = min(_round_up(th, 128), H_p)
        while cand > 128:
            if H_p % cand == 0 and need(TM, cand, 2) <= budget:
                TH = cand
                break
            cand -= 128
    n_wbuf = n_wbuf_res if TH == H_p else 2
    # If still over budget, shrink the token tile.
    while TM > 8 and need(TM, TH, n_wbuf) > budget:
        TM = max(8, _round_up(TM // 2, 8))

    M_p = _round_up(M, TM)
    n_m, n_h = M_p // TM, H_p // TH
    resident = n_h == 1

    # --- pad/cast activations (skipped when already aligned) ---
    x2d = x.reshape(M, C_in)
    if M_p != M or C_in_p != C_in:
        x2d = jnp.pad(x2d, ((0, M_p - M), (0, C_in_p - C_in)))
    x_p = x2d.astype(compute_dtype)

    vmem_limit = int(min(0.85 * vmem_cap,
                         max(32 << 20, 1.5 * need(TM, TH, n_wbuf) + (4 << 20))))

    weight_reads = 1 if resident else n_m  # H axis innermost => refetch per M tile
    cost = pl.CostEstimate(
        flops=2 * M * C_in * H + 2 * M * H * C_out,
        transcendentals=M * H,  # one exp per hidden activation (GELU)
        bytes_accessed=int(M_p * C_in_p * cb
                           + weight_reads * ((C_in_p * H_p + H_p * C_out_p) * cb
                                             + (H_p + C_out_p) * 4)
                           + M_p * C_out_p * ob),
    )

    if resident:
        kernel = _mlp_kernel_resident
        scratch = []
    else:
        kernel = _mlp_kernel_tiled
        scratch = [pltpu.VMEM((TM, C_out_p), jnp.float32)]

    def call(use_buffered):
        def wspec(shape, index_map):
            if use_buffered:
                return pl.BlockSpec(shape, index_map, pipeline_mode=pl.Buffered(1))
            return pl.BlockSpec(shape, index_map)

        return pl.pallas_call(
            kernel,
            out_shape=jax.ShapeDtypeStruct((M_p, C_out_p), orig_dtype),
            grid=(n_m, n_h),
            in_specs=[
                pl.BlockSpec((TM, C_in_p), lambda i, j: (i, 0)),   # x (pipelined over M)
                wspec((C_in_p, TH), lambda i, j: (0, j)),          # w1
                wspec((1, TH), lambda i, j: (0, j)),               # b1 (f32)
                wspec((TH, C_out_p), lambda i, j: (j, 0)),         # w2
                wspec((1, C_out_p), lambda i, j: (0, 0)),          # b2 (f32, constant)
            ],
            out_specs=pl.BlockSpec((TM, C_out_p), lambda i, j: (i, 0)),
            scratch_shapes=scratch,
            compiler_params=pltpu.CompilerParams(
                dimension_semantics=("parallel", "arbitrary"),
                vmem_limit_bytes=vmem_limit),
            cost_estimate=cost,
        )(x_p, w1_p, b1_p, w2_p, b2_p)

    if resident and _HAS_BUFFERED:
        # Weights/biases are grid-constant here: single-buffering halves their VMEM.
        try:
            out_p = call(True)
        except Exception:  # pragma: no cover - fall back if Buffered(1) unsupported
            out_p = call(False)
    else:
        out_p = call(False)

    if M_p != M or C_out_p != C_out:
        out_p = out_p[:M, :C_out]
    return out_p.reshape(*lead, C_out)


def mlp_layer(x, w1, b1, w2, b2, *, compute_dtype=jnp.bfloat16, tm=None, th=None):
    """MLPLayer.forward: fc1 -> exact GELU -> fc2 (Dropout(p=0) is the identity).

    compute_dtype is fed to the MXU (bf16 default => 4-8x MXU throughput);
    accumulation, bias adds and GELU stay f32, only the final store downcasts.
    For repeated calls, hoist prepare_mlp_params(...) out of the loop.
    """
    params = prepare_mlp_params(w1, b1, w2, b2, compute_dtype=compute_dtype)
    return mlp_layer_prepared(x, params, tm=tm, th=th)


def init_mlp_params(key, in_features, hidden_features, out_features,
                    dtype=jnp.float32):
    """nn.Linear-style init (kaiming-uniform weights, uniform biases); weights
    stored transposed as (in, out) for x @ W."""
    k1, k2, k3, k4 = jax.random.split(key, 4)

    def linear(kw, kb, fan_in, fan_out):
        bound_w = math.sqrt(1.0 / fan_in) * math.sqrt(3.0)
        w = jax.random.uniform(kw, (fan_in, fan_out), dtype,
                               minval=-bound_w, maxval=bound_w)
        bound_b = 1.0 / math.sqrt(fan_in)
        b = jax.random.uniform(kb, (fan_out,), dtype,
                               minval=-bound_b, maxval=bound_b)
        return w, b

    w1, b1 = linear(k1, k2, in_features, hidden_features)
    w2, b2 = linear(k3, k4, hidden_features, out_features)
    return w1, b1, w2, b2


if __name__ == "__main__":
    key = jax.random.PRNGKey(0)
    kx, kp = jax.random.split(key)

    # Small shapes consistent with the module's forward (Linear over the last dim).
    B, N = 2, 8
    in_features, hidden_features, out_features = 32, 64, 32

    x = jax.random.normal(kx, (B, N, in_features), dtype=jnp.float32)
    w1, b1, w2, b2 = init_mlp_params(kp, in_features, hidden_features,
                                     out_features)

    # Pure-JAX reference of the same math (exact erf GELU, true-f32 matmuls).
    with jax.default_matmul_precision("highest"):
        ref = jax.nn.gelu(x @ w1 + b1, approximate=False) @ w2 + b2

    # f32 MXU-input path: tight match against the f32 reference.
    out_f32 = jax.block_until_ready(
        mlp_layer(x, w1, b1, w2, b2, compute_dtype=jnp.float32))
    assert out_f32.shape == (B, N, out_features)
    assert out_f32.dtype == x.dtype
    assert jnp.allclose(out_f32, ref, atol=2e-3, rtol=2e-3)

    # Default bf16-MXU / f32-accumulate performance path, via hoisted params.
    params_bf16 = prepare_mlp_params(w1, b1, w2, b2, compute_dtype=jnp.bfloat16)
    out_bf16 = jax.block_until_ready(mlp_layer_prepared(x, params_bf16))
    assert out_bf16.shape == (B, N, out_features)
    assert out_bf16.dtype == x.dtype
    assert jnp.allclose(out_bf16, ref, atol=7.5e-2, rtol=5e-2)

    print("KERNEL_OK")
</pallas_src>

<mosaic_0001>
module attributes {stable_mosaic.version = 11 : i64} {
  func.func @_mlp_kernel_resident(%arg0: i32, %arg1: i32, %arg2: memref<8x128xf32, #tpu.memory_space<vmem>>, %arg3: memref<128x128xf32, #tpu.memory_space<vmem>>, %arg4: memref<1x128xf32, #tpu.memory_space<vmem>>, %arg5: memref<128x128xf32, #tpu.memory_space<vmem>>, %arg6: memref<1x128xf32, #tpu.memory_space<vmem>>, %arg7: memref<8x128xf32, #tpu.memory_space<vmem>>) attributes {dimension_semantics = [#tpu.dimension_semantics<parallel>, #tpu.dimension_semantics<arbitrary>], iteration_bounds = array<i64: 2, 1>, scalar_prefetch = 0 : i64, scratch_operands = 0 : i64, tpu.core_type = #tpu.core_type<tc>, window_params = [{transform_indices = @transform_0, window_bounds = array<i64: 8, 128>}, {pipeline_mode = #tpu.pipeline_mode<synchronous>, transform_indices = @transform_1, window_bounds = array<i64: 128, 128>}, {pipeline_mode = #tpu.pipeline_mode<synchronous>, transform_indices = @transform_2, window_bounds = array<i64: 1, 128>}, {pipeline_mode = #tpu.pipeline_mode<synchronous>, transform_indices = @transform_3, window_bounds = array<i64: 128, 128>}, {pipeline_mode = #tpu.pipeline_mode<synchronous>, transform_indices = @transform_4, window_bounds = array<i64: 1, 128>}, {transform_indices = @transform_5, window_bounds = array<i64: 8, 128>}]} {
    %c0 = arith.constant 0 : index
    %c0_0 = arith.constant 0 : index
    %0 = vector.load %arg2[%c0, %c0_0] : memref<8x128xf32, #tpu.memory_space<vmem>>, vector<8x128xf32>
    %c0_1 = arith.constant 0 : index
    %c0_2 = arith.constant 0 : index
    %1 = vector.load %arg3[%c0_1, %c0_2] : memref<128x128xf32, #tpu.memory_space<vmem>>, vector<128x128xf32>
    %cst = arith.constant dense<0.000000e+00> : vector<8x128xf32>
    %2 = tpu.matmul %0, %1, %cst {dimension_numbers = #tpu.dot_dimension_numbers<[1], [0], [0], [1], [0, 0, 1, 1], [], []>} : vector<8x128xf32>, vector<128x128xf32>, vector<8x128xf32> -> vector<8x128xf32>
    %c0_3 = arith.constant 0 : index
    %c0_4 = arith.constant 0 : index
    %3 = vector.load %arg4[%c0_3, %c0_4] : memref<1x128xf32, #tpu.memory_space<vmem>>, vector<1x128xf32>
    %4 = vector.broadcast %3 : vector<1x128xf32> to vector<8x128xf32>
    %5 = arith.addf %2, %4 : vector<8x128xf32>
    %cst_5 = arith.constant 0.707106769 : f32
    %6 = vector.broadcast %cst_5 : f32 to vector<8x128xf32>
    %7 = arith.mulf %5, %6 : vector<8x128xf32>
    %8 = math.absf %7 : vector<8x128xf32>
    %cst_6 = arith.constant 0.327591091 : f32
    %9 = vector.broadcast %cst_6 : f32 to vector<8x128xf32>
    %10 = arith.mulf %9, %8 : vector<8x128xf32>
    %cst_7 = arith.constant 1.000000e+00 : f32
    %11 = vector.broadcast %cst_7 : f32 to vector<8x128xf32>
    %12 = arith.addf %11, %10 : vector<8x128xf32>
    %cst_8 = arith.constant 1.000000e+00 : f32
    %13 = vector.broadcast %cst_8 : f32 to vector<8x128xf32>
    %14 = arith.divf %13, %12 : vector<8x128xf32>
    %cst_9 = arith.constant 1.06140542 : f32
    %15 = vector.broadcast %cst_9 : f32 to vector<8x128xf32>
    %16 = arith.mulf %15, %14 : vector<8x128xf32>
    %cst_10 = arith.constant -1.45315206 : f32
    %17 = vector.broadcast %cst_10 : f32 to vector<8x128xf32>
    %18 = arith.addf %16, %17 : vector<8x128xf32>
    %19 = arith.mulf %18, %14 : vector<8x128xf32>
    %cst_11 = arith.constant 1.42141378 : f32
    %20 = vector.broadcast %cst_11 : f32 to vector<8x128xf32>
    %21 = arith.addf %19, %20 : vector<8x128xf32>
    %22 = arith.mulf %21, %14 : vector<8x128xf32>
    %cst_12 = arith.constant -0.284496725 : f32
    %23 = vector.broadcast %cst_12 : f32 to vector<8x128xf32>
    %24 = arith.addf %22, %23 : vector<8x128xf32>
    %25 = arith.mulf %24, %14 : vector<8x128xf32>
    %cst_13 = arith.constant 0.254829586 : f32
    %26 = vector.broadcast %cst_13 : f32 to vector<8x128xf32>
    %27 = arith.addf %25, %26 : vector<8x128xf32>
    %28 = arith.mulf %27, %14 : vector<8x128xf32>
    %29 = arith.mulf %8, %8 : vector<8x128xf32>
    %cst_14 = arith.constant 0.000000e+00 : f32
    %30 = vector.broadcast %cst_14 : f32 to vector<8x128xf32>
    %31 = arith.subf %30, %29 : vector<8x128xf32>
    %32 = math.exp %31 : vector<8x128xf32>
    %33 = arith.mulf %28, %32 : vector<8x128xf32>
    %cst_15 = arith.constant 1.000000e+00 : f32
    %34 = vector.broadcast %cst_15 : f32 to vector<8x128xf32>
    %35 = arith.subf %34, %33 : vector<8x128xf32>
    %cst_16 = arith.constant 0.000000e+00 : f32
    %36 = vector.broadcast %cst_16 : f32 to vector<8x128xf32>
    %37 = arith.cmpf olt, %7, %36 : vector<8x128xf32>
    %cst_17 = arith.constant 0.000000e+00 : f32
    %38 = vector.broadcast %cst_17 : f32 to vector<8x128xf32>
    %39 = arith.subf %38, %35 : vector<8x128xf32>
    %40 = arith.select %37, %39, %35 : vector<8x128xi1>, vector<8x128xf32>
    %cst_18 = arith.constant 1.000000e+00 : f32
    %41 = vector.broadcast %cst_18 : f32 to vector<8x128xf32>
    %42 = arith.addf %41, %40 : vector<8x128xf32>
    %cst_19 = arith.constant 5.000000e-01 : f32
    %43 = vector.broadcast %cst_19 : f32 to vector<8x128xf32>
    %44 = arith.mulf %43, %42 : vector<8x128xf32>
    %45 = arith.mulf %5, %44 : vector<8x128xf32>
    %c0_20 = arith.constant 0 : index
    %c0_21 = arith.constant 0 : index
    %46 = vector.load %arg5[%c0_20, %c0_21] : memref<128x128xf32, #tpu.memory_space<vmem>>, vector<128x128xf32>
    %cst_22 = arith.constant dense<0.000000e+00> : vector<8x128xf32>
    %47 = tpu.matmul %45, %46, %cst_22 {dimension_numbers = #tpu.dot_dimension_numbers<[1], [0], [0], [1], [0, 0, 1, 1], [], []>} : vector<8x128xf32>, vector<128x128xf32>, vector<8x128xf32> -> vector<8x128xf32>
    %c0_23 = arith.constant 0 : index
    %c0_24 = arith.constant 0 : index
    %48 = vector.load %arg6[%c0_23, %c0_24] : memref<1x128xf32, #tpu.memory_space<vmem>>, vector<1x128xf32>
    %49 = vector.broadcast %48 : vector<1x128xf32> to vector<8x128xf32>
    %50 = arith.addf %47, %49 : vector<8x128xf32>
    %c0_25 = arith.constant 0 : index
    %c0_26 = arith.constant 0 : index
    %51 = vector.load %arg7[%c0_25, %c0_26] : memref<8x128xf32, #tpu.memory_space<vmem>>, vector<8x128xf32>
    tpu.vector_store %arg7[%c0_25, %c0_26], %50 {strides = array<i32>} : memref<8x128xf32, #tpu.memory_space<vmem>>, vector<8x128xf32>,
    return
  }
  func.func @transform_0(%arg0: i32, %arg1: i32) -> (i32, i32) {
    %c0_i32 = arith.constant 0 : i32
    %c0_i32_0 = arith.constant 0 : i32
    return %arg0, %c0_i32 : i32, i32
  }
  func.func @transform_1(%arg0: i32, %arg1: i32) -> (i32, i32) {
    %c0_i32 = arith.constant 0 : i32
    %c0_i32_0 = arith.constant 0 : i32
    return %c0_i32, %arg1 : i32, i32
  }
  func.func @transform_2(%arg0: i32, %arg1: i32) -> (i32, i32) {
    %c0_i32 = arith.constant 0 : i32
    %c0_i32_0 = arith.constant 0 : i32
    return %c0_i32, %arg1 : i32, i32
  }
  func.func @transform_3(%arg0: i32, %arg1: i32) -> (i32, i32) {
    %c0_i32 = arith.constant 0 : i32
    %c0_i32_0 = arith.constant 0 : i32
    return %arg1, %c0_i32 : i32, i32
  }
  func.func @transform_4(%arg0: i32, %arg1: i32) -> (i32, i32) {
    %c0_i32 = arith.constant 0 : i32
    %c0_i32_0 = arith.constant 0 : i32
    %c0_i32_1 = arith.constant 0 : i32
    return %c0_i32, %c0_i32_0 : i32, i32
  }
  func.func @transform_5(%arg0: i32, %arg1: i32) -> (i32, i32) {
    %c0_i32 = arith.constant 0 : i32
    %c0_i32_0 = arith.constant 0 : i32
    return %arg0, %c0_i32 : i32, i32
  }
}

module attributes {stable_mosaic.version = 11 : i64} {
  func.func @_mlp_kernel_resident(%arg0: i32, %arg1: i32, %arg2: memref<8x128xf32, #tpu.memory_space<vmem>>, %arg3: memref<128x128xf32, #tpu.memory_space<vmem>>, %arg4: memref<1x128xf32, #tpu.memory_space<vmem>>, %arg5: memref<128x128xf32, #tpu.memory_space<vmem>>, %arg6: memref<1x128xf32, #tpu.memory_space<vmem>>, %arg7: memref<8x128xf32, #tpu.memory_space<vmem>>) attributes {dimension_semantics = [#tpu.dimension_semantics<parallel>, #tpu.dimension_semantics<arbitrary>], iteration_bounds = array<i64: 2, 1>, scalar_prefetch = 0 : i64, scratch_operands = 0 : i64, tpu.core_type = #tpu.core_type<tc>, window_params = [{transform_indices = @transform_0, window_bounds = array<i64: 8, 128>}, {transform_indices = @transform_1, window_bounds = array<i64: 128, 128>}, {transform_indices = @transform_2, window_bounds = array<i64: 1, 128>}, {transform_indices = @transform_3, window_bounds = array<i64: 128, 128>}, {pipeline_mode = #tpu.pipeline_mode<synchronous>, transform_indices = @transform_4, window_bounds = array<i64: 1, 128>}, {transform_indices = @transform_5, window_bounds = array<i64: 8, 128>}]} {
    %c0 = arith.constant 0 : index
    %c0_0 = arith.constant 0 : index
    %0 = vector.load %arg2[%c0, %c0_0] : memref<8x128xf32, #tpu.memory_space<vmem>>, vector<8x128xf32>
    %c0_1 = arith.constant 0 : index
    %c0_2 = arith.constant 0 : index
    %1 = vector.load %arg3[%c0_1, %c0_2] : memref<128x128xf32, #tpu.memory_space<vmem>>, vector<128x128xf32>
    %cst = arith.constant dense<0.000000e+00> : vector<8x128xf32>
    %2 = tpu.matmul %0, %1, %cst {dimension_numbers = #tpu.dot_dimension_numbers<[1], [0], [0], [1], [0, 0, 1, 1], [], []>} : vector<8x128xf32>, vector<128x128xf32>, vector<8x128xf32> -> vector<8x128xf32>
    %c0_3 = arith.constant 0 : index
    %c0_4 = arith.constant 0 : index
    %3 = vector.load %arg4[%c0_3, %c0_4] : memref<1x128xf32, #tpu.memory_space<vmem>>, vector<1x128xf32>
    %4 = vector.broadcast %3 : vector<1x128xf32> to vector<8x128xf32>
    %5 = arith.addf %2, %4 : vector<8x128xf32>
    %cst_5 = arith.constant 0.707106769 : f32
    %6 = vector.broadcast %cst_5 : f32 to vector<8x128xf32>
    %7 = arith.mulf %5, %6 : vector<8x128xf32>
    %8 = math.absf %7 : vector<8x128xf32>
    %cst_6 = arith.constant 0.327591091 : f32
    %9 = vector.broadcast %cst_6 : f32 to vector<8x128xf32>
    %10 = arith.mulf %9, %8 : vector<8x128xf32>
    %cst_7 = arith.constant 1.000000e+00 : f32
    %11 = vector.broadcast %cst_7 : f32 to vector<8x128xf32>
    %12 = arith.addf %11, %10 : vector<8x128xf32>
    %cst_8 = arith.constant 1.000000e+00 : f32
    %13 = vector.broadcast %cst_8 : f32 to vector<8x128xf32>
    %14 = arith.divf %13, %12 : vector<8x128xf32>
    %cst_9 = arith.constant 1.06140542 : f32
    %15 = vector.broadcast %cst_9 : f32 to vector<8x128xf32>
    %16 = arith.mulf %15, %14 : vector<8x128xf32>
    %cst_10 = arith.constant -1.45315206 : f32
    %17 = vector.broadcast %cst_10 : f32 to vector<8x128xf32>
    %18 = arith.addf %16, %17 : vector<8x128xf32>
    %19 = arith.mulf %18, %14 : vector<8x128xf32>
    %cst_11 = arith.constant 1.42141378 : f32
    %20 = vector.broadcast %cst_11 : f32 to vector<8x128xf32>
    %21 = arith.addf %19, %20 : vector<8x128xf32>
    %22 = arith.mulf %21, %14 : vector<8x128xf32>
    %cst_12 = arith.constant -0.284496725 : f32
    %23 = vector.broadcast %cst_12 : f32 to vector<8x128xf32>
    %24 = arith.addf %22, %23 : vector<8x128xf32>
    %25 = arith.mulf %24, %14 : vector<8x128xf32>
    %cst_13 = arith.constant 0.254829586 : f32
    %26 = vector.broadcast %cst_13 : f32 to vector<8x128xf32>
    %27 = arith.addf %25, %26 : vector<8x128xf32>
    %28 = arith.mulf %27, %14 : vector<8x128xf32>
    %29 = arith.mulf %8, %8 : vector<8x128xf32>
    %cst_14 = arith.constant 0.000000e+00 : f32
    %30 = vector.broadcast %cst_14 : f32 to vector<8x128xf32>
    %31 = arith.subf %30, %29 : vector<8x128xf32>
    %32 = math.exp %31 : vector<8x128xf32>
    %33 = arith.mulf %28, %32 : vector<8x128xf32>
    %cst_15 = arith.constant 1.000000e+00 : f32
    %34 = vector.broadcast %cst_15 : f32 to vector<8x128xf32>
    %35 = arith.subf %34, %33 : vector<8x128xf32>
    %cst_16 = arith.constant 0.000000e+00 : f32
    %36 = vector.broadcast %cst_16 : f32 to vector<8x128xf32>
    %37 = arith.cmpf olt, %7, %36 : vector<8x128xf32>
    %cst_17 = arith.constant 0.000000e+00 : f32
    %38 = vector.broadcast %cst_17 : f32 to vector<8x128xf32>
    %39 = arith.subf %38, %35 : vector<8x128xf32>
    %40 = arith.select %37, %39, %35 : vector<8x128xi1>, vector<8x128xf32>
    %cst_18 = arith.constant 1.000000e+00 : f32
    %41 = vector.broadcast %cst_18 : f32 to vector<8x128xf32>
    %42 = arith.addf %41, %40 : vector<8x128xf32>
    %cst_19 = arith.constant 5.000000e-01 : f32
    %43 = vector.broadcast %cst_19 : f32 to vector<8x128xf32>
    %44 = arith.mulf %43, %42 : vector<8x128xf32>
    %45 = arith.mulf %5, %44 : vector<8x128xf32>
    %c0_20 = arith.constant 0 : index
    %c0_21 = arith.constant 0 : index
    %46 = vector.load %arg5[%c0_20, %c0_21] : memref<128x128xf32, #tpu.memory_space<vmem>>, vector<128x128xf32>
    %cst_22 = arith.constant dense<0.000000e+00> : vector<8x128xf32>
    %47 = tpu.matmul %45, %46, %cst_22 {dimension_numbers = #tpu.dot_dimension_numbers<[1], [0], [0], [1], [0, 0, 1, 1], [], []>} : vector<8x128xf32>, vector<128x128xf32>, vector<8x128xf32> -> vector<8x128xf32>
    %c0_23 = arith.constant 0 : index
    %c0_24 = arith.constant 0 : index
    %48 = vector.load %arg6[%c0_23, %c0_24] : memref<1x128xf32, #tpu.memory_space<vmem>>, vector<1x128xf32>
    %49 = vector.broadcast %48 : vector<1x128xf32> to vector<8x128xf32>
    %50 = arith.addf %47, %49 : vector<8x128xf32>
    %c0_25 = arith.constant 0 : index
    %c0_26 = arith.constant 0 : index
    %51 = vector.load %arg7[%c0_25, %c0_26] : memref<8x128xf32, #tpu.memory_space<vmem>>, vector<8x128xf32>
    tpu.vector_store %arg7[%c0_25, %c0_26], %50 {strides = array<i32>} : memref<8x128xf32, #tpu.memory_space<vmem>>, vector<8x128xf32>,
    return
  }
  func.func @transform_0(%arg0: i32, %arg1: i32) -> (i32, i32) {
    %c0_i32 = arith.constant 0 : i32
    %c0_i32_0 = arith.constant 0 : i32
    return %arg0, %c0_i32 : i32, i32
  }
  func.func @transform_1(%arg0: i32, %arg1: i32) -> (i32, i32) {
    %c0_i32 = arith.constant 0 : i32
    %c0_i32_0 = arith.constant 0 : i32
    return %c0_i32, %arg1 : i32, i32
  }
  func.func @transform_2(%arg0: i32, %arg1: i32) -> (i32, i32) {
    %c0_i32 = arith.constant 0 : i32
    %c0_i32_0 = arith.constant 0 : i32
    return %c0_i32, %arg1 : i32, i32
  }
  func.func @transform_3(%arg0: i32, %arg1: i32) -> (i32, i32) {
    %c0_i32 = arith.constant 0 : i32
    %c0_i32_0 = arith.constant 0 : i32
    return %arg1, %c0_i32 : i32, i32
  }
  func.func @transform_4(%arg0: i32, %arg1: i32) -> (i32, i32) {
    %c0_i32 = arith.constant 0 : i32
    %c0_i32_0 = arith.constant 0 : i32
    %c0_i32_1 = arith.constant 0 : i32
    return %c0_i32, %c0_i32_0 : i32, i32
  }
  func.func @transform_5(%arg0: i32, %arg1: i32) -> (i32, i32) {
    %c0_i32 = arith.constant 0 : i32
    %c0_i32_0 = arith.constant 0 : i32
    return %arg0, %c0_i32 : i32, i32
  }
}

</mosaic_0001>

<bundles_post_ra>
// kernel: tpu_custom_call.1
= control target key start
LH: loop header
LB: loop body
LE: loop exit
PB: predicated region body
PF: predicated region fallthrough
CT: control target
= control target key end

     0   :  { %10 = vsyncpa [#allocation3], 0  ;;  %s1409_s0 = inlined_call_operand.hbm [shape: f32[16,128], index: 0, kind: input, shape index: {}]   ;;  %s1410_s1 = inlined_call_operand.hbm [shape: f32[128,128], index: 1, kind: input, shape index: {}]   ;;  %s1411_s2 = inlined_call_operand.vmem [shape: f32[1,128], index: 2, kind: input, shape index: {}]   ;;  %s1412_s3 = inlined_call_operand.hbm [shape: f32[128,128], index: 3, kind: input, shape index: {}]   ;;  %s1413_s4 = inlined_call_operand.vmem [shape: f32[1,128], index: 4, kind: input, shape index: {}]   ;;  %s1414_s5 = inlined_call_operand.hbm [shape: f32[16,128], index: 5, kind: output, shape index: {}]  }
   0x1   :  { %12 = vsyncpa [#allocation3 + $0x1], 0 }
   0x2   :  { %13 = vsyncpa [#allocation6], 0 }
   0x3   :  { %14 = vsyncpa [#allocation4], 0 }
   0x4   :  { %16 = vsyncpa [#allocation4 + $0x1], 0  ;;  %s1130_s18 = smov 0   ;;  %s1132_s19 = smov 0  }
   0x5   :  { %s1134_s20 = smov 0   ;;  %s1136_s21 = smov 0  }
   0x6   :  { %s1138_s22 = smov 0   ;;  %s1140_s23 = smov 0  }
   0x7 LB: > { %s653_s24 = sadd.s32 4294967295, %s1089_s23   ;;  %s654_s25 = sadd.s32 4294967294, %s1089_s23   ;;  %s1089_s23 = sphi %s1140_s23, %s22_s23   ;;  %s1085_s22 = sphi %s1138_s22, %s1436_s22   ;;  %s1081_s21 = sphi %s1136_s21, %s1435_s21   ;;  %s1077_s20 = sphi %s1134_s20, %s1434_s20   ;;  %s1073_s19 = sphi %s1132_s19, %s1433_s19   ;;  %s1069_s18 = sphi %s1130_s18, %s1432_s18  }
   0x8   : > { %p54_p0 = scmp.ne.s32.totalorder %s1073_s19, %s1069_s18  ;;  %p1164_p1 = scmp.eq.s32.totalorder %s653_s24, 0 }
   0x9   : > { %p1168_p2 = scmp.eq.s32.totalorder %s653_s24, 1  ;;  %p183_p3 = scmp.eq.s32.totalorder %s654_s25, 1 }
   0xa   : > { %s1419_s26 = scalar_select %p1164_p1, 1, 0 }
   0xb   : > { %p1174_p4 = por %p1164_p1, %p54_p0  ;;  %p655_p5 = scmp.ge.s32.totalorder %s1089_s23, 1 }
   0xc   : > { %p1179_p6 = por %p183_p3, %p54_p0  ;;  %p190_p7 = scmp.lt.s32.totalorder %s1089_s23, 3 }
   0xd   : > { %s1421_s28 = scalar_select %p1174_p4, 1, 0 }
   0xe   : > { %s1422_s29 = scalar_select %p1179_p6, 1, 0 }
   0xf   : > { %p1184_p8 = pnand %p655_p5, %p190_p7  ;;  %s1091_s6 = smov [#allocation5]  }
  0x10   : > { %s204_s7 = sshll.u32 %s1091_s6, 4  ;;  %s1092_s9 = smov [#allocation7]   ;;  %s1188_s7 = int_to_ptr.vmem [resolvable:$true] %s204_s7 }
  0x11   : > { %p837_p9 = pneg %p1184_p8  ;;  %s226_s10 = sshll.u32 %s1092_s9, 4  ;;  %s1199_s10 = int_to_ptr.vmem [resolvable:$true] %s226_s10 }
  0x12   : > { %s917_s13 = scalar_lea.hbm %s1410_s1, 2048 }
  0x13   : > { %p1195_p11 = pnand %p837_p9, %p1164_p1  ;;  %p918_p12 = scmp.ne.s32.totalorder %s1410_s1, %s917_s13 }
  0x14   : > { %p924_p5 = scmp.lt.u32.totalorder %s917_s13, %s1410_s1 }
  0x15   : > { %p919_p13 = pneg %p1195_p11 }
  0x17   : > { %p920_p0 = pnand %p919_p13, %p918_p12 }
  0x19   : > { %p921_p3 = pneg %p920_p0 }
  0x1b   : > { %p926_p7 = pnand %p924_p5, %p921_p3 }
  0x1d   : > { %929 = shalt.err (!%p926_p7)
}
  0x1e   : > { %s930_s24 = scalar_lea.vmem %s1188_s7, 2048  ;;  %p938_p1 = scmp.lt.s32.totalorder %s1188_s7, %s1188_s7 }
  0x1f   : > { %p931_p9 = scmp.ne.s32.totalorder %s1188_s7, %s930_s24  ;;  %p939_p12 = scmp.lt.s32.totalorder %s930_s24, %s930_s24 }
  0x21   : > { %p933_p10 = pnand %p931_p9, %p919_p13  ;;  %p940_p0 = por %p939_p12, %p938_p1 }
  0x23   : > { %p934_p6 = pneg %p933_p10 }
  0x25   : > { %p941_p4 = pnand %p940_p0, %p934_p6 }
  0x27   : > { %944 = shalt.err (!%p941_p4)
}
  0x28   : > { %s1093_s25 = smov 128   ;;  %s1094_s6 = smov 8  }
  0x29   : > { %840 = dma.hbm_to_vmem [thread:$0]  (!%p1195_p11), %s1410_s1, 2048, %s1188_s7, [#allocation6], %s1093_s25, %s1093_s25, %s1094_s6  }
  0x2a   : > { %s945_s14 = scalar_lea.hbm %s1412_s3, 2048 }
  0x2b   : > { %p946_p1 = scmp.ne.s32.totalorder %s1412_s3, %s945_s14  ;;  %p952_p10 = scmp.lt.u32.totalorder %s945_s14, %s1412_s3 }
  0x2d   : > { %p948_p4 = pnand %p946_p1, %p919_p13 }
  0x2f   : > { %p949_p6 = pneg %p948_p4 }
  0x31   : > { %p954_p3 = pnand %p952_p10, %p949_p6 }
  0x33   : > { %957 = shalt.err (!%p954_p3)
}
  0x34   : > { %s958_s7 = scalar_lea.vmem %s1199_s10, 2048  ;;  %p966_p12 = scmp.lt.s32.totalorder %s1199_s10, %s1199_s10 }
  0x35   : > { %p959_p5 = scmp.ne.s32.totalorder %s1199_s10, %s958_s7  ;;  %p967_p0 = scmp.lt.s32.totalorder %s958_s7, %s958_s7 }
  0x37   : > { %p961_p7 = pnand %p959_p5, %p919_p13  ;;  %p968_p1 = por %p967_p0, %p966_p12 }
  0x39   : > { %p962_p9 = pneg %p961_p7 }
  0x3b   : > { %p969_p4 = pnand %p968_p1, %p962_p9 }
  0x3d   : > { %972 = shalt.err (!%p969_p4)
}
  0x3e   : > { %843 = dma.hbm_to_vmem [thread:$0]  (!%p1195_p11), %s1412_s3, 2048, %s1199_s10, [#allocation6], %s1093_s25, %s1093_s25, %s1094_s6  }
  0x3f   : > { %s34_s12 = sadd.s32 1, %s1085_s22  ;;  %s41_s13 = sadd.s32 1, %s1077_s20 }
  0x40   : > { %p36_p13 = scmp.ge.s32.totalorder %s34_s12, 2  ;;  %p48_p6 = scmp.ne.s32.totalorder %s1077_s20, %s1073_s19 }
  0x41   : > { %p49_p10 = scmp.eq.s32.totalorder %s1089_s23, 0  ;;  %p854_p3 = scmp.lt.s32.totalorder %s1089_s23, 2 }
  0x42   : > { %s1438_s12 = smov (%p36_p13, %s34_s12), 0  ;;  %p1263_p7 = por %p1168_p2, %p48_p6 }
  0x43   : > { %p50_p5 = por %p49_p10, %p48_p6  ;;  %s38_s14 = ssub.s32 %s1085_s22, %s1438_s12 }
  0x44   : > { %s1425_s8 = scalar_select %p1263_p7, 1, 0 }
  0x45   : > { %s243_s15 = sand.u32 1, %s1077_s20   ;;  %p39_p9 = scmp.eq.s32.totalorder %s38_s14, 0 }
  0x46   : > { %s660_s10 = sshll.u32 %s243_s15, 3  ;;  %s661_s25 = sshll.u32 %s1085_s22, 7 }
  0x47   : > { %s1272_s6 = scalar_select %p39_p9, %s1077_s20, %s41_s13  }
  0x48   : > { %s1277_s24 = scalar_lea.hbm %s1409_s0, %s661_s25  ;;  %s247_s27 = scalar_lea.vmem [#allocation2], %s660_s10 }
  0x49   : > { %s254_s7 = sshll.u32 %s247_s27, 4  ;;  %p1281_p2 = pnand %p854_p3, %p50_p5  ;;  %s1285_s7 = int_to_ptr.vmem [resolvable:$true] %s254_s7 }
  0x4a   : > { %s244_s11 = scalar_lea.sflag [#allocation3], %s243_s15  ;;  %s973_s13 = scalar_lea.hbm %s1277_s24, 128 }
  0x4b   : > { %p974_p11 = scmp.ne.s32.totalorder %s1277_s24, %s973_s13  ;;  %p975_p12 = pneg %p1281_p2 }
  0x4c   : > { %s978_s25 = scalar_lea.hbm %s1409_s0, 256  ;;  %p979_p4 = scmp.lt.u32.totalorder %s1277_s24, %s1409_s0 }
  0x4d   : > { %p976_p0 = pnand %p975_p12, %p974_p11  ;;  %p980_p13 = scmp.lt.u32.totalorder %s978_s25, %s973_s13 }
  0x4e   : > { %p982_p10 = scmp.lt.u32.totalorder %s973_s13, %s1277_s24 }
  0x4f   : > { %p977_p1 = pneg %p976_p0  ;;  %p981_p6 = por %p980_p13, %p979_p4 }
  0x51   : > { %p983_p3 = por %p982_p10, %p981_p6 }
  0x53   : > { %p984_p5 = pnand %p983_p3, %p977_p1 }
  0x55   : > { %987 = shalt.err (!%p984_p5)
}
  0x56   : > { %s988_s15 = scalar_lea.vmem %s1285_s7, 128  ;;  %s1095_s27 = smov [#allocation2]  }
  0x57   : > { %p989_p9 = scmp.ne.s32.totalorder %s1285_s7, %s988_s15  ;;  %s993_s14 = sshll.u32 %s1095_s27, 4  ;;  %s994_s14 = int_to_ptr.vmem [resolvable:$false] %s993_s14 }
  0x58   : > { %s995_s10 = scalar_lea.vmem %s994_s14, 256  ;;  %p996_p7 = scmp.lt.s32.totalorder %s1285_s7, %s994_s14 }
  0x59   : > { %p991_p11 = pnand %p989_p9, %p975_p12  ;;  %p997_p4 = scmp.lt.s32.totalorder %s995_s10, %s988_s15 }
  0x5b   : > { %p992_p0 = pneg %p991_p11  ;;  %p998_p13 = por %p997_p4, %p996_p7 }
  0x5d   : > { %p999_p6 = pnand %p998_p13, %p992_p0 }
  0x5f   : > { %1002 = shalt.err (!%p999_p6)
}
  0x60   : > { %847 = dma.hbm_to_vmem [thread:$0]  (!%p1281_p2), %s1277_s24, 128, %s1285_s7, %s244_s11  }
  0x61   : > { %263 = sbr.rel (%p1184_p8) target bundleno = 635 (0x27b), region = 40  ;;  %s1315_s13 = sand.u32 (!%p1184_p8), 1, %s1073_s19  }
  0x62   : > { %s663_s25 = sshll.u32 (!%p1184_p8), %s1315_s13, 3  ;;  %s266_s16 = scalar_lea.sflag (!%p1184_p8), [#allocation3], %s1315_s13 }
  0x63   : > { %s1321_s17 = scalar_lea.vmem (!%p1184_p8), [#allocation2], %s663_s25  ;;  %p1427_p7 = scmp.ne.s32.totalorder (!%p1184_p8), %s1421_s28, 0 }
  0x68   : > { %1056 = dma.done.wait (%p1427_p7), %s266_s16, 128  }
  0x69   : > { %1058 = vsyncadd (%p1427_p7), %s266_s16, 4294967168  ;;  %p1428_p2 = scmp.ne.s32.totalorder %s1419_s26, 0 }
  0x6b   : > { %1060 = dma.done.wait (%p1428_p2), [#allocation6], 4096  }
  0x6c   : > { %1062 = vsyncadd (%p1428_p2), [#allocation6], 4294963200  ;;  %v1096_v0 = vmov 0.0|0.0   ;;  %vm1097_vm0 = vmmov 0   ;;  %v1098_v1 = vmov 0.0   ;;  %v312_v2 = vld [vmem:[#allocation5] sm:$0xff] }
  0x6d   : > { %777 = vmatprep.subr.bf16.mxu0 %v1096_v0  ;;  %739 = vmatprep.mubr.msk.f32.mxu0 %vm1097_vm0, %v1098_v1  ;;  %v313_v3 = vld [vmem:[#allocation5 + $0x8] sm:$0xff]  ;;  %v314_v4 = vld [vmem:[#allocation5 + $0x10] sm:$0xff]  ;;  %v315_v6 = vld [vmem:[#allocation5 + $0x18] sm:$0xff]  ;;  %s670_s7 = sshll.u32 %s1081_s21, 7  ;;  %s306_s9 = scalar_lea.vmem [#allocation8], %s663_s25 }
  0x6e   : > { %801 = vmatprep.subr.bf16.mxu1 %v1096_v0  ;;  %774 = vmatprep.mubr.msk.f32.mxu1 %vm1097_vm0, %v1098_v1  ;;  %v778_v5 = vpack.c.bf16 %v313_v3, %v312_v2  ;;  %v781_v7 = vpack.c.bf16 %v315_v6, %v314_v4  ;;  %v316_v8 = vld [vmem:[#allocation5 + $0x20] sm:$0xff]  ;;  %v317_v9 = vld [vmem:[#allocation5 + $0x28] sm:$0xff]  ;;  %v318_v11 = vld [vmem:[#allocation5 + $0x30] sm:$0xff]  ;;  %s540_s11 = sshll.u32 %s306_s9, 4  ;;  %s1360_s14 = scalar_lea.hbm %s1414_s5, %s670_s7  ;;  %s1362_s11 = int_to_ptr.vmem [resolvable:$true] %s540_s11 }
  0x6f   : > { %v784_v10 = vpack.c.bf16 %v317_v9, %v316_v8  ;;  %v319_v12 = vld [vmem:[#allocation5 + $0x38] sm:$0xff]  ;;  %v320_v14 = vld [vmem:[#allocation5 + $0x40] sm:$0xff]  ;;  %v321_v15 = vld [vmem:[#allocation5 + $0x48] sm:$0xff]  ;;  %s527_s10 = scalar_lea.sflag [#allocation4], %s1315_s13  ;;  %s1003_s16 = scalar_lea.vmem %s1362_s11, 128 }
  0x70   : > { %779 = vmatpush3.bf16.msra.mxu0 %v778_v5  ;;  %v787_v13 = vpack.c.bf16 %v319_v12, %v318_v11  ;;  %v790_v16 = vpack.c.bf16 %v321_v15, %v320_v14  ;;  %v322_v17 = vld [vmem:[#allocation5 + $0x50] sm:$0xff]  ;;  %v323_v18 = vld [vmem:[#allocation5 + $0x58] sm:$0xff]  ;;  %v324_v20 = vld [vmem:[#allocation5 + $0x60] sm:$0xff]  ;;  %p1004_p8 = scmp.ne.s32.totalorder %s1362_s11, %s1003_s16  ;;  %p1429_p12 = scmp.ne.s32.totalorder %s1425_s8, 0 }
  0x71   : > { %780 = vmatprep.subr.bf16.mxu0 %v1096_v0  ;;  %v793_v19 = vpack.c.bf16 %v323_v18, %v322_v17  ;;  %v325_v21 = vld [vmem:[#allocation5 + $0x68] sm:$0xff]  ;;  %v326_v23 = vld [vmem:[#allocation5 + $0x70] sm:$0xff]  ;;  %v327_v24 = vld [vmem:[#allocation5 + $0x78] sm:$0xff]  ;;  %s1099_s21 = smov [#allocation8]  }
  0x72   : > { %v796_v22 = vpack.c.bf16 %v325_v21, %v324_v20  ;;  %v799_v25 = vpack.c.bf16 %v327_v24, %v326_v23  ;;  %v311_v26 = vld [vmem:[%s1321_s17] sm:$0xff]  ;;  %v432_v27 = vld [vmem:[#allocation7] sm:$0xff]  ;;  %v433_v28 = vld [vmem:[#allocation7 + $0x8] sm:$0xff]  ;;  %p1005_p1 = pnand %p1004_p8, %p1429_p12  ;;  %s1007_s25 = sshll.u32 %s1099_s21, 4  ;;  %s1008_s25 = int_to_ptr.vmem [resolvable:$false] %s1007_s25 }
  0x73   : > { %v802_v29 = vpack.c.bf16 %v433_v28, %v432_v27  ;;  %v434_v30 = vld [vmem:[#allocation7 + $0x10] sm:$0xff]  ;;  %v435_v31 = vld [vmem:[#allocation7 + $0x18] sm:$0xff]  ;;  %v436_v33 = vld [vmem:[#allocation7 + $0x20] sm:$0xff]  ;;  %s1009_s17 = scalar_lea.vmem %s1008_s25, 256  ;;  %p1010_p3 = scmp.lt.s32.totalorder %s1362_s11, %s1008_s25 }
  0x74   : > { %782 = vmatpush3.bf16.msra.mxu0 %v781_v7  ;;  %v805_v32 = vpack.c.bf16 %v435_v31, %v434_v30  ;;  %v437_v34 = vld [vmem:[#allocation7 + $0x28] sm:$0xff]  ;;  %v438_v36 = vld [vmem:[#allocation7 + $0x30] sm:$0xff]  ;;  %v439_v37 = vld [vmem:[#allocation7 + $0x38] sm:$0xff]  ;;  %p1006_p10 = pneg %p1005_p1  ;;  %p1011_p5 = scmp.lt.s32.totalorder %s1009_s17, %s1003_s16 }
  0x75   : > { %783 = vmatprep.subr.bf16.mxu0 %v1096_v0  ;;  %803 = vmatpush3.bf16.msra.mxu1 %v802_v29  ;;  %v808_v35 = vpack.c.bf16 %v437_v34, %v436_v33  ;;  %v811_v38 = vpack.c.bf16 %v439_v37, %v438_v36  ;;  %v440_v39 = vld [vmem:[#allocation7 + $0x40] sm:$0xff]  ;;  %v441_v40 = vld [vmem:[#allocation7 + $0x48] sm:$0xff]  ;;  %v442_v42 = vld [vmem:[#allocation7 + $0x50] sm:$0xff] }
  0x76   : > { %804 = vmatprep.subr.bf16.mxu1 %v1096_v0  ;;  %v814_v41 = vpack.c.bf16 %v441_v40, %v440_v39  ;;  %v443_v43 = vld [vmem:[#allocation7 + $0x58] sm:$0xff]  ;;  %v444_v45 = vld [vmem:[#allocation7 + $0x60] sm:$0xff]  ;;  %v445_v46 = vld [vmem:[#allocation7 + $0x68] sm:$0xff]  ;;  %p1012_p9 = por %p1011_p5, %p1010_p3 }
  0x77   : > { %v817_v44 = vpack.c.bf16 %v443_v43, %v442_v42  ;;  %v820_v47 = vpack.c.bf16 %v445_v46, %v444_v45  ;;  %v446_v48 = vld [vmem:[#allocation7 + $0x70] sm:$0xff]  ;;  %v447_v49 = vld [vmem:[#allocation7 + $0x78] sm:$0xff] }
  0x78   : > { %785 = vmatpush3.bf16.msra.mxu0 %v784_v10  ;;  %v823_v50 = vpack.c.bf16 %v447_v49, %v446_v48  ;;  %v667_v51 = vld [vmem:[%s1411_s2] ss:$0 sm:$0xff]  ;;  %p1013_p11 = pnand %p1012_p9, %p1006_p10 }
  0x79   : > { %786 = vmatprep.subr.bf16.mxu0 %v1096_v0  ;;  %806 = vmatpush3.bf16.msra.mxu1 %v805_v32 }
  0x7a   : > { %807 = vmatprep.subr.bf16.mxu1 %v1096_v0 }
  0x7c   : > { %788 = vmatpush3.bf16.msra.mxu0 %v787_v13 }
  0x7d   : > { %789 = vmatprep.subr.bf16.mxu0 %v1096_v0  ;;  %809 = vmatpush3.bf16.msra.mxu1 %v808_v35 }
  0x7e   : > { %810 = vmatprep.subr.bf16.mxu1 %v1096_v0 }
  0x80   : > { %791 = vmatpush3.bf16.msra.mxu0 %v790_v16  ;;  %v668_v16 = vld [vmem:[%s1413_s4] ss:$0 sm:$0xff] }
  0x81   : > { %792 = vmatprep.subr.bf16.mxu0 %v1096_v0  ;;  %812 = vmatpush3.bf16.msra.mxu1 %v811_v38 }
  0x82   : > { %813 = vmatprep.subr.bf16.mxu1 %v1096_v0 }
  0x84   : > { %794 = vmatpush3.bf16.msra.mxu0 %v793_v19 }
  0x85   : > { %795 = vmatprep.subr.bf16.mxu0 %v1096_v0  ;;  %815 = vmatpush3.bf16.msra.mxu1 %v814_v41 }
  0x86   : > { %816 = vmatprep.subr.bf16.mxu1 %v1096_v0 }
  0x88   : > { %797 = vmatpush3.bf16.msra.mxu0 %v796_v22 }
  0x89   : > { %798 = vmatprep.subr.bf16.mxu0 %v1096_v0  ;;  %818 = vmatpush3.bf16.msra.mxu1 %v817_v44 }
  0x8a   : > { %819 = vmatprep.subr.bf16.mxu1 %v1096_v0 }
  0x8c   : > { %800 = vmatpush3.bf16.msra.mxu0 %v799_v25 }
  0x8d   : > { %821 = vmatpush3.bf16.msra.mxu1 %v820_v47 }
  0x8e   : > { %822 = vmatprep.subr.bf16.mxu1 %v1096_v0 }
  0x8f   : > { %740 = vmatmul.mubr.f32.vlgmr.msra.gmra.mrb[0].mxu0 %v311_v26 }
  0x91   : > { %824 = vmatpush3.bf16.msra.mxu1 %v823_v50 }
 0x162   : > { %v401_v52 = vpop.f32.mrb[0].mxu0 }
 0x163   : > { %v402_v53 = vadd.f32 %v667_v51, %v401_v52  ;;  %v741_v54 = vpop.f32.mrb[1].mxu0 }
 0x165   : > { %v405_v55 = vmul.f32 0.70710677, %v402_v53 }
 0x167   : > { %v406_v56 = vand.u32 2147483647, %v405_v55  ;;  %vm426_vm1 = vcmp.lt.f32.partialorder %v405_v55, 0.0 }
 0x169   : > { %v407_v57 = vmul.f32 0.3275911, %v406_v56  ;;  %v420_v59 = vmul.f32 %v406_v56, %v406_v56 }
 0x16b   : > { %v408_v58 = vadd.f32 1.0, %v407_v57  ;;  %v421_v61 = vsub.f32 0.0, %v420_v59 }
 0x16d   : > { %913 = vrcp.f32 %v408_v58  ;;  %v422_v0 = vmul.f32 1.442695, %v421_v61 }
 0x16f   : > { %915 = vpow2.f32 %v422_v0 }
 0x177   : > { %v914_v60 = vpop.eup %913 }
 0x178   : > { %v411_v62 = vmul.f32 1.0614054, %v914_v60 }
 0x179   : > { %v916_v8 = vpop.eup %915 }
 0x17a   : > { %v412_v63 = vadd.f32 -1.4531521, %v411_v62 }
 0x17c   : > { %v413_v1 = vmul.f32 %v914_v60, %v412_v63 }
 0x17e   : > { %v414_v2 = vadd.f32 1.4214138, %v413_v1 }
 0x180   : > { %v415_v3 = vmul.f32 %v914_v60, %v414_v2 }
 0x182   : > { %v416_v4 = vadd.f32 -0.28449672, %v415_v3 }
 0x184   : > { %v417_v5 = vmul.f32 %v914_v60, %v416_v4 }
 0x186   : > { %v418_v6 = vadd.f32 0.2548296, %v417_v5 }
 0x188   : > { %v419_v7 = vmul.f32 %v914_v60, %v418_v6 }
 0x18a   : > { %v424_v9 = vmul.f32 %v916_v8, %v419_v7 }
 0x18c   : > { %v425_v10 = vsub.f32 1.0, %v424_v9 }
 0x18e   : > { %v427_v11 = vsub.f32 0.0, %v425_v10 }
 0x190   : > { %v428_v12 = vsel %vm426_vm1, %v427_v11, %v425_v10 }
 0x191   : > { %v429_v13 = vadd.f32 1.0, %v428_v12 }
 0x193   : > { %v430_v14 = vmul.f32 0.5, %v429_v13 }
 0x195   : > { %v431_v15 = vmul.f32 %v430_v14, %v402_v53 }
 0x197   : > { %775 = vmatmul.mubr.f32.vlgmr.msra.gmra.mrb[0].mxu1 %v431_v15 }
 0x26a   : > { %v521_v17 = vpop.f32.mrb[0].mxu1 }
 0x26b   : > { %v522_v18 = vadd.f32 %v668_v16, %v521_v17  ;;  %v776_v19 = vpop.f32.mrb[1].mxu1 }
 0x26d   : > { %525 = vst [vmem:[%s306_s9] sm:$0xff] %v522_v18 }
 0x26e   : > { %1016 = shalt.err (!%p1013_p11)
}
 0x26f   : > { %s1017_s13 = scalar_lea.hbm %s1360_s14, 128  ;;  %s1021_s30 = scalar_lea.hbm %s1414_s5, 256 }
 0x270   : > { %p1018_p0 = scmp.ne.s32.totalorder %s1360_s14, %s1017_s13  ;;  %p1022_p6 = scmp.lt.u32.totalorder %s1360_s14, %s1414_s5 }
 0x271   : > { %p1023_p7 = scmp.lt.u32.totalorder %s1021_s30, %s1017_s13  ;;  %p1025_p8 = scmp.lt.u32.totalorder %s1017_s13, %s1360_s14 }
 0x272   : > { %p1019_p4 = pnand %p1018_p0, %p1429_p12 }
 0x273   : > { %p1024_p2 = por %p1023_p7, %p1022_p6 }
 0x274   : > { %p1020_p13 = pneg %p1019_p4 }
 0x275   : > { %p1026_p1 = por %p1025_p8, %p1024_p2 }
 0x277   : > { %p1027_p10 = pnand %p1026_p1, %p1020_p13 }
 0x279   : > { %1030 = shalt.err (!%p1027_p10)
}
 0x27a   : > { %835 = dma.vmem_to_hbm [thread:$0]  (%p1429_p12), %s1362_s11, 128, %s1360_s14, %s527_s10  }
 0x27b PF: > { %s552_s9 = sand.u32 1, %s1069_s18   ;;  %p1430_p3 = scmp.ne.s32.totalorder %s1422_s29, 0 }
 0x27c   : > { %p1431_p5 = scmp.ge.s32.totalorder %s1089_s23, 2  ;;  %s553_s15 = scalar_lea.sflag [#allocation4], %s552_s9 }
 0x27e   : > { %p849_p9 = pnand %p1431_p5, %p1430_p3 }
 0x280   : > { %1064 = dma.done.wait (!%p849_p9), %s553_s15, 128  }
 0x281   : > { %1066 = vsyncadd (!%p849_p9), %s553_s15, 4294967168  ;;  %s22_s23 = sadd.s32 1, %s1089_s23   ;;  %s1432_s18 = smov %s1073_s19 }
 0x282   : > { %p19_p11 = scmp.ge.s32.totalorder %s22_s23, 4   ;;  %s1433_s19 = smov %s1077_s20 }
 0x283   : > { %s1434_s20 = smov %s1272_s6  ;;  %s1435_s21 = smov %s1085_s22 }
 0x284   : > { %s1436_s22 = smov %s1438_s12  ;;  %21 = sbr.rel (!%p19_p11) target bundleno = 7 (0x7), region = 98 }
 0x28b   :  { %558 = vsyncpa [#allocation3], 1 }
 0x28c   :  { %560 = vsyncpa [#allocation3 + $0x1], 1 }
 0x28d   :  { %561 = vsyncpa [#allocation6], 1 }
 0x28e   :  { %562 = vsyncpa [#allocation4], 1 }
 0x28f   :  { %564 = vsyncpa [#allocation4 + $0x1], 1 }

// kernel: tpu_custom_call.1
= control target key start
LH: loop header
LB: loop body
LE: loop exit
PB: predicated region body
PF: predicated region fallthrough
CT: control target
= control target key end

     0   :  { %10 = vsyncpa [#allocation3], 0  ;;  %s1409_s0 = inlined_call_operand.hbm [shape: f32[16,128], index: 0, kind: input, shape index: {}]   ;;  %s1410_s1 = inlined_call_operand.hbm [shape: f32[128,128], index: 1, kind: input, shape index: {}]   ;;  %s1411_s2 = inlined_call_operand.vmem [shape: f32[1,128], index: 2, kind: input, shape index: {}]   ;;  %s1412_s3 = inlined_call_operand.hbm [shape: f32[128,128], index: 3, kind: input, shape index: {}]   ;;  %s1413_s4 = inlined_call_operand.vmem [shape: f32[1,128], index: 4, kind: input, shape index: {}]   ;;  %s1414_s5 = inlined_call_operand.hbm [shape: f32[16,128], index: 5, kind: output, shape index: {}]  }
   0x1   :  { %12 = vsyncpa [#allocation3 + $0x1], 0 }
   0x2   :  { %13 = vsyncpa [#allocation6], 0 }
   0x3   :  { %14 = vsyncpa [#allocation4], 0 }
   0x4   :  { %16 = vsyncpa [#allocation4 + $0x1], 0  ;;  %s1130_s18 = smov 0   ;;  %s1132_s19 = smov 0  }
   0x5   :  { %s1134_s20 = smov 0   ;;  %s1136_s21 = smov 0  }
   0x6   :  { %s1138_s22 = smov 0   ;;  %s1140_s23 = smov 0  }
   0x7 LB: > { %s653_s24 = sadd.s32 4294967295, %s1089_s23   ;;  %s654_s25 = sadd.s32 4294967294, %s1089_s23   ;;  %s1089_s23 = sphi %s1140_s23, %s22_s23   ;;  %s1085_s22 = sphi %s1138_s22, %s1436_s22   ;;  %s1081_s21 = sphi %s1136_s21, %s1435_s21   ;;  %s1077_s20 = sphi %s1134_s20, %s1434_s20   ;;  %s1073_s19 = sphi %s1132_s19, %s1433_s19   ;;  %s1069_s18 = sphi %s1130_s18, %s1432_s18  }
   0x8   : > { %p54_p0 = scmp.ne.s32.totalorder %s1073_s19, %s1069_s18  ;;  %p1164_p1 = scmp.eq.s32.totalorder %s653_s24, 0 }
   0x9   : > { %p1168_p2 = scmp.eq.s32.totalorder %s653_s24, 1  ;;  %p183_p3 = scmp.eq.s32.totalorder %s654_s25, 1 }
   0xa   : > { %s1419_s26 = scalar_select %p1164_p1, 1, 0 }
   0xb   : > { %p1174_p4 = por %p1164_p1, %p54_p0  ;;  %p655_p5 = scmp.ge.s32.totalorder %s1089_s23, 1 }
   0xc   : > { %p1179_p6 = por %p183_p3, %p54_p0  ;;  %p190_p7 = scmp.lt.s32.totalorder %s1089_s23, 3 }
   0xd   : > { %s1421_s28 = scalar_select %p1174_p4, 1, 0 }
   0xe   : > { %s1422_s29 = scalar_select %p1179_p6, 1, 0 }
   0xf   : > { %p1184_p8 = pnand %p655_p5, %p190_p7  ;;  %s1091_s6 = smov [#allocation5]  }
  0x10   : > { %s204_s7 = sshll.u32 %s1091_s6, 4  ;;  %s1092_s9 = smov [#allocation7]   ;;  %s1188_s7 = int_to_ptr.vmem [resolvable:$true] %s204_s7 }
  0x11   : > { %p837_p9 = pneg %p1184_p8  ;;  %s226_s10 = sshll.u32 %s1092_s9, 4  ;;  %s1199_s10 = int_to_ptr.vmem [resolvable:$true] %s226_s10 }
  0x12   : > { %s917_s13 = scalar_lea.hbm %s1410_s1, 2048 }
  0x13   : > { %p1195_p11 = pnand %p837_p9, %p1164_p1  ;;  %p918_p12 = scmp.ne.s32.totalorder %s1410_s1, %s917_s13 }
  0x14   : > { %p924_p5 = scmp.lt.u32.totalorder %s917_s13, %s1410_s1 }
  0x15   : > { %p919_p13 = pneg %p1195_p11 }
  0x17   : > { %p920_p0 = pnand %p919_p13, %p918_p12 }
  0x19   : > { %p921_p3 = pneg %p920_p0 }
  0x1b   : > { %p926_p7 = pnand %p924_p5, %p921_p3 }
  0x1d   : > { %929 = shalt.err (!%p926_p7)
}
  0x1e   : > { %s930_s24 = scalar_lea.vmem %s1188_s7, 2048  ;;  %p938_p1 = scmp.lt.s32.totalorder %s1188_s7, %s1188_s7 }
  0x1f   : > { %p931_p9 = scmp.ne.s32.totalorder %s1188_s7, %s930_s24  ;;  %p939_p12 = scmp.lt.s32.totalorder %s930_s24, %s930_s24 }
  0x21   : > { %p933_p10 = pnand %p931_p9, %p919_p13  ;;  %p940_p0 = por %p939_p12, %p938_p1 }
  0x23   : > { %p934_p6 = pneg %p933_p10 }
  0x25   : > { %p941_p4 = pnand %p940_p0, %p934_p6 }
  0x27   : > { %944 = shalt.err (!%p941_p4)
}
  0x28   : > { %s1093_s25 = smov 128   ;;  %s1094_s6 = smov 8  }
  0x29   : > { %840 = dma.hbm_to_vmem [thread:$0]  (!%p1195_p11), %s1410_s1, 2048, %s1188_s7, [#allocation6], %s1093_s25, %s1093_s25, %s1094_s6  }
  0x2a   : > { %s945_s14 = scalar_lea.hbm %s1412_s3, 2048 }
  0x2b   : > { %p946_p1 = scmp.ne.s32.totalorder %s1412_s3, %s945_s14  ;;  %p952_p10 = scmp.lt.u32.totalorder %s945_s14, %s1412_s3 }
  0x2d   : > { %p948_p4 = pnand %p946_p1, %p919_p13 }
  0x2f   : > { %p949_p6 = pneg %p948_p4 }
  0x31   : > { %p954_p3 = pnand %p952_p10, %p949_p6 }
  0x33   : > { %957 = shalt.err (!%p954_p3)
}
  0x34   : > { %s958_s7 = scalar_lea.vmem %s1199_s10, 2048  ;;  %p966_p12 = scmp.lt.s32.totalorder %s1199_s10, %s1199_s10 }
  0x35   : > { %p959_p5 = scmp.ne.s32.totalorder %s1199_s10, %s958_s7  ;;  %p967_p0 = scmp.lt.s32.totalorder %s958_s7, %s958_s7 }
  0x37   : > { %p961_p7 = pnand %p959_p5, %p919_p13  ;;  %p968_p1 = por %p967_p0, %p966_p12 }
  0x39   : > { %p962_p9 = pneg %p961_p7 }
  0x3b   : > { %p969_p4 = pnand %p968_p1, %p962_p9 }
  0x3d   : > { %972 = shalt.err (!%p969_p4)
}
  0x3e   : > { %843 = dma.hbm_to_vmem [thread:$0]  (!%p1195_p11), %s1412_s3, 2048, %s1199_s10, [#allocation6], %s1093_s25, %s1093_s25, %s1094_s6  }
  0x3f   : > { %s34_s12 = sadd.s32 1, %s1085_s22  ;;  %s41_s13 = sadd.s32 1, %s1077_s20 }
  0x40   : > { %p36_p13 = scmp.ge.s32.totalorder %s34_s12, 2  ;;  %p48_p6 = scmp.ne.s32.totalorder %s1077_s20, %s1073_s19 }
  0x41   : > { %p49_p10 = scmp.eq.s32.totalorder %s1089_s23, 0  ;;  %p854_p3 = scmp.lt.s32.totalorder %s1089_s23, 2 }
  0x42   : > { %s1438_s12 = smov (%p36_p13, %s34_s12), 0  ;;  %p1263_p7 = por %p1168_p2, %p48_p6 }
  0x43   : > { %p50_p5 = por %p49_p10, %p48_p6  ;;  %s38_s14 = ssub.s32 %s1085_s22, %s1438_s12 }
  0x44   : > { %s1425_s8 = scalar_select %p1263_p7, 1, 0 }
  0x45   : > { %s243_s15 = sand.u32 1, %s1077_s20   ;;  %p39_p9 = scmp.eq.s32.totalorder %s38_s14, 0 }
  0x46   : > { %s660_s10 = sshll.u32 %s243_s15, 3  ;;  %s661_s25 = sshll.u32 %s1085_s22, 7 }
  0x47   : > { %s1272_s6 = scalar_select %p39_p9, %s1077_s20, %s41_s13  }
  0x48   : > { %s1277_s24 = scalar_lea.hbm %s1409_s0, %s661_s25  ;;  %s247_s27 = scalar_lea.vmem [#allocation2], %s660_s10 }
  0x49   : > { %s254_s7 = sshll.u32 %s247_s27, 4  ;;  %p1281_p2 = pnand %p854_p3, %p50_p5  ;;  %s1285_s7 = int_to_ptr.vmem [resolvable:$true] %s254_s7 }
  0x4a   : > { %s244_s11 = scalar_lea.sflag [#allocation3], %s243_s15  ;;  %s973_s13 = scalar_lea.hbm %s1277_s24, 128 }
  0x4b   : > { %p974_p11 = scmp.ne.s32.totalorder %s1277_s24, %s973_s13  ;;  %p975_p12 = pneg %p1281_p2 }
  0x4c   : > { %s978_s25 = scalar_lea.hbm %s1409_s0, 256  ;;  %p979_p4 = scmp.lt.u32.totalorder %s1277_s24, %s1409_s0 }
  0x4d   : > { %p976_p0 = pnand %p975_p12, %p974_p11  ;;  %p980_p13 = scmp.lt.u32.totalorder %s978_s25, %s973_s13 }
  0x4e   : > { %p982_p10 = scmp.lt.u32.totalorder %s973_s13, %s1277_s24 }
  0x4f   : > { %p977_p1 = pneg %p976_p0  ;;  %p981_p6 = por %p980_p13, %p979_p4 }
  0x51   : > { %p983_p3 = por %p982_p10, %p981_p6 }
  0x53   : > { %p984_p5 = pnand %p983_p3, %p977_p1 }
  0x55   : > { %987 = shalt.err (!%p984_p5)
}
  0x56   : > { %s988_s15 = scalar_lea.vmem %s1285_s7, 128  ;;  %s1095_s27 = smov [#allocation2]  }
  0x57   : > { %p989_p9 = scmp.ne.s32.totalorder %s1285_s7, %s988_s15  ;;  %s993_s14 = sshll.u32 %s1095_s27, 4  ;;  %s994_s14 = int_to_ptr.vmem [resolvable:$false] %s993_s14 }
  0x58   : > { %s995_s10 = scalar_lea.vmem %s994_s14, 256  ;;  %p996_p7 = scmp.lt.s32.totalorder %s1285_s7, %s994_s14 }
  0x59   : > { %p991_p11 = pnand %p989_p9, %p975_p12  ;;  %p997_p4 = scmp.lt.s32.totalorder %s995_s10, %s988_s15 }
  0x5b   : > { %p992_p0 = pneg %p991_p11  ;;  %p998_p13 = por %p997_p4, %p996_p7 }
  0x5d   : > { %p999_p6 = pnand %p998_p13, %p992_p0 }
  0x5f   : > { %1002 = shalt.err (!%p999_p6)
}
  0x60   : > { %847 = dma.hbm_to_vmem [thread:$0]  (!%p1281_p2), %s1277_s24, 128, %s1285_s7, %s244_s11  }
  0x61   : > { %263 = sbr.rel (%p1184_p8) target bundleno = 635 (0x27b), region = 40  ;;  %s1315_s13 = sand.u32 (!%p1184_p8), 1, %s1073_s19  }
  0x62   : > { %s663_s25 = sshll.u32 (!%p1184_p8), %s1315_s13, 3  ;;  %s266_s16 = scalar_lea.sflag (!%p1184_p8), [#allocation3], %s1315_s13 }
  0x63   : > { %s1321_s17 = scalar_lea.vmem (!%p1184_p8), [#allocation2], %s663_s25  ;;  %p1427_p7 = scmp.ne.s32.totalorder (!%p1184_p8), %s1421_s28, 0 }
  0x68   : > { %1056 = dma.done.wait (%p1427_p7), %s266_s16, 128  }
  0x69   : > { %1058 = vsyncadd (%p1427_p7), %s266_s16, 4294967168  ;;  %p1428_p2 = scmp.ne.s32.totalorder %s1419_s26, 0 }
  0x6b   : > { %1060 = dma.done.wait (%p1428_p2), [#allocation6], 4096  }
  0x6c   : > { %1062 = vsyncadd (%p1428_p2), [#allocation6], 4294963200  ;;  %v1096_v0 = vmov 0.0|0.0   ;;  %vm1097_vm0 = vmmov 0   ;;  %v1098_v1 = vmov 0.0   ;;  %v312_v2 = vld [vmem:[#allocation5] sm:$0xff] }
  0x6d   : > { %777 = vmatprep.subr.bf16.mxu0 %v1096_v0  ;;  %739 = vmatprep.mubr.msk.f32.mxu0 %vm1097_vm0, %v1098_v1  ;;  %v313_v3 = vld [vmem:[#allocation5 + $0x8] sm:$0xff]  ;;  %v314_v4 = vld [vmem:[#allocation5 + $0x10] sm:$0xff]  ;;  %v315_v6 = vld [vmem:[#allocation5 + $0x18] sm:$0xff]  ;;  %s670_s7 = sshll.u32 %s1081_s21, 7  ;;  %s306_s9 = scalar_lea.vmem [#allocation8], %s663_s25 }
  0x6e   : > { %801 = vmatprep.subr.bf16.mxu1 %v1096_v0  ;;  %774 = vmatprep.mubr.msk.f32.mxu1 %vm1097_vm0, %v1098_v1  ;;  %v778_v5 = vpack.c.bf16 %v313_v3, %v312_v2  ;;  %v781_v7 = vpack.c.bf16 %v315_v6, %v314_v4  ;;  %v316_v8 = vld [vmem:[#allocation5 + $0x20] sm:$0xff]  ;;  %v317_v9 = vld [vmem:[#allocation5 + $0x28] sm:$0xff]  ;;  %v318_v11 = vld [vmem:[#allocation5 + $0x30] sm:$0xff]  ;;  %s540_s11 = sshll.u32 %s306_s9, 4  ;;  %s1360_s14 = scalar_lea.hbm %s1414_s5, %s670_s7  ;;  %s1362_s11 = int_to_ptr.vmem [resolvable:$true] %s540_s11 }
  0x6f   : > { %v784_v10 = vpack.c.bf16 %v317_v9, %v316_v8  ;;  %v319_v12 = vld [vmem:[#allocation5 + $0x38] sm:$0xff]  ;;  %v320_v14 = vld [vmem:[#allocation5 + $0x40] sm:$0xff]  ;;  %v321_v15 = vld [vmem:[#allocation5 + $0x48] sm:$0xff]  ;;  %s527_s10 = scalar_lea.sflag [#allocation4], %s1315_s13  ;;  %s1003_s16 = scalar_lea.vmem %s1362_s11, 128 }
  0x70   : > { %779 = vmatpush3.bf16.msra.mxu0 %v778_v5  ;;  %v787_v13 = vpack.c.bf16 %v319_v12, %v318_v11  ;;  %v790_v16 = vpack.c.bf16 %v321_v15, %v320_v14  ;;  %v322_v17 = vld [vmem:[#allocation5 + $0x50] sm:$0xff]  ;;  %v323_v18 = vld [vmem:[#allocation5 + $0x58] sm:$0xff]  ;;  %v324_v20 = vld [vmem:[#allocation5 + $0x60] sm:$0xff]  ;;  %p1004_p8 = scmp.ne.s32.totalorder %s1362_s11, %s1003_s16  ;;  %p1429_p12 = scmp.ne.s32.totalorder %s1425_s8, 0 }
  0x71   : > { %780 = vmatprep.subr.bf16.mxu0 %v1096_v0  ;;  %v793_v19 = vpack.c.bf16 %v323_v18, %v322_v17  ;;  %v325_v21 = vld [vmem:[#allocation5 + $0x68] sm:$0xff]  ;;  %v326_v23 = vld [vmem:[#allocation5 + $0x70] sm:$0xff]  ;;  %v327_v24 = vld [vmem:[#allocation5 + $0x78] sm:$0xff]  ;;  %s1099_s21 = smov [#allocation8]  }
  0x72   : > { %v796_v22 = vpack.c.bf16 %v325_v21, %v324_v20  ;;  %v799_v25 = vpack.c.bf16 %v327_v24, %v326_v23  ;;  %v311_v26 = vld [vmem:[%s1321_s17] sm:$0xff]  ;;  %v432_v27 = vld [vmem:[#allocation7] sm:$0xff]  ;;  %v433_v28 = vld [vmem:[#allocation7 + $0x8] sm:$0xff]  ;;  %p1005_p1 = pnand %p1004_p8, %p1429_p12  ;;  %s1007_s25 = sshll.u32 %s1099_s21, 4  ;;  %s1008_s25 = int_to_ptr.vmem [resolvable:$false] %s1007_s25 }
  0x73   : > { %v802_v29 = vpack.c.bf16 %v433_v28, %v432_v27  ;;  %v434_v30 = vld [vmem:[#allocation7 + $0x10] sm:$0xff]  ;;  %v435_v31 = vld [vmem:[#allocation7 + $0x18] sm:$0xff]  ;;  %v436_v33 = vld [vmem:[#allocation7 + $0x20] sm:$0xff]  ;;  %s1009_s17 = scalar_lea.vmem %s1008_s25, 256  ;;  %p1010_p3 = scmp.lt.s32.totalorder %s1362_s11, %s1008_s25 }
  0x74   : > { %782 = vmatpush3.bf16.msra.mxu0 %v781_v7  ;;  %v805_v32 = vpack.c.bf16 %v435_v31, %v434_v30  ;;  %v437_v34 = vld [vmem:[#allocation7 + $0x28] sm:$0xff]  ;;  %v438_v36 = vld [vmem:[#allocation7 + $0x30] sm:$0xff]  ;;  %v439_v37 = vld [vmem:[#allocation7 + $0x38] sm:$0xff]  ;;  %p1006_p10 = pneg %p1005_p1  ;;  %p1011_p5 = scmp.lt.s32.totalorder %s1009_s17, %s1003_s16 }
  0x75   : > { %783 = vmatprep.subr.bf16.mxu0 %v1096_v0  ;;  %803 = vmatpush3.bf16.msra.mxu1 %v802_v29  ;;  %v808_v35 = vpack.c.bf16 %v437_v34, %v436_v33  ;;  %v811_v38 = vpack.c.bf16 %v439_v37, %v438_v36  ;;  %v440_v39 = vld [vmem:[#allocation7 + $0x40] sm:$0xff]  ;;  %v441_v40 = vld [vmem:[#allocation7 + $0x48] sm:$0xff]  ;;  %v442_v42 = vld [vmem:[#allocation7 + $0x50] sm:$0xff] }
  0x76   : > { %804 = vmatprep.subr.bf16.mxu1 %v1096_v0  ;;  %v814_v41 = vpack.c.bf16 %v441_v40, %v440_v39  ;;  %v443_v43 = vld [vmem:[#allocation7 + $0x58] sm:$0xff]  ;;  %v444_v45 = vld [vmem:[#allocation7 + $0x60] sm:$0xff]  ;;  %v445_v46 = vld [vmem:[#allocation7 + $0x68] sm:$0xff]  ;;  %p1012_p9 = por %p1011_p5, %p1010_p3 }
  0x77   : > { %v817_v44 = vpack.c.bf16 %v443_v43, %v442_v42  ;;  %v820_v47 = vpack.c.bf16 %v445_v46, %v444_v45  ;;  %v446_v48 = vld [vmem:[#allocation7 + $0x70] sm:$0xff]  ;;  %v447_v49 = vld [vmem:[#allocation7 + $0x78] sm:$0xff] }
  0x78   : > { %785 = vmatpush3.bf16.msra.mxu0 %v784_v10  ;;  %v823_v50 = vpack.c.bf16 %v447_v49, %v446_v48  ;;  %v667_v51 = vld [vmem:[%s1411_s2] ss:$0 sm:$0xff]  ;;  %p1013_p11 = pnand %p1012_p9, %p1006_p10 }
  0x79   : > { %786 = vmatprep.subr.bf16.mxu0 %v1096_v0  ;;  %806 = vmatpush3.bf16.msra.mxu1 %v805_v32 }
  0x7a   : > { %807 = vmatprep.subr.bf16.mxu1 %v1096_v0 }
  0x7c   : > { %788 = vmatpush3.bf16.msra.mxu0 %v787_v13 }
  0x7d   : > { %789 = vmatprep.subr.bf16.mxu0 %v1096_v0  ;;  %809 = vmatpush3.bf16.msra.mxu1 %v808_v35 }
  0x7e   : > { %810 = vmatprep.subr.bf16.mxu1 %v1096_v0 }
  0x80   : > { %791 = vmatpush3.bf16.msra.mxu0 %v790_v16  ;;  %v668_v16 = vld [vmem:[%s1413_s4] ss:$0 sm:$0xff] }
  0x81   : > { %792 = vmatprep.subr.bf16.mxu0 %v1096_v0  ;;  %812 = vmatpush3.bf16.msra.mxu1 %v811_v38 }
  0x82   : > { %813 = vmatprep.subr.bf16.mxu1 %v1096_v0 }
  0x84   : > { %794 = vmatpush3.bf16.msra.mxu0 %v793_v19 }
  0x85   : > { %795 = vmatprep.subr.bf16.mxu0 %v1096_v0  ;;  %815 = vmatpush3.bf16.msra.mxu1 %v814_v41 }
  0x86   : > { %816 = vmatprep.subr.bf16.mxu1 %v1096_v0 }
  0x88   : > { %797 = vmatpush3.bf16.msra.mxu0 %v796_v22 }
  0x89   : > { %798 = vmatprep.subr.bf16.mxu0 %v1096_v0  ;;  %818 = vmatpush3.bf16.msra.mxu1 %v817_v44 }
  0x8a   : > { %819 = vmatprep.subr.bf16.mxu1 %v1096_v0 }
  0x8c   : > { %800 = vmatpush3.bf16.msra.mxu0 %v799_v25 }
  0x8d   : > { %821 = vmatpush3.bf16.msra.mxu1 %v820_v47 }
  0x8e   : > { %822 = vmatprep.subr.bf16.mxu1 %v1096_v0 }
  0x8f   : > { %740 = vmatmul.mubr.f32.vlgmr.msra.gmra.mrb[0].mxu0 %v311_v26 }
  0x91   : > { %824 = vmatpush3.bf16.msra.mxu1 %v823_v50 }
 0x162   : > { %v401_v52 = vpop.f32.mrb[0].mxu0 }
 0x163   : > { %v402_v53 = vadd.f32 %v667_v51, %v401_v52  ;;  %v741_v54 = vpop.f32.mrb[1].mxu0 }
 0x165   : > { %v405_v55 = vmul.f32 0.70710677, %v402_v53 }
 0x167   : > { %v406_v56 = vand.u32 2147483647, %v405_v55  ;;  %vm426_vm1 = vcmp.lt.f32.partialorder %v405_v55, 0.0 }
 0x169   : > { %v407_v57 = vmul.f32 0.3275911, %v406_v56  ;;  %v420_v59 = vmul.f32 %v406_v56, %v406_v56 }
 0x16b   : > { %v408_v58 = vadd.f32 1.0, %v407_v57  ;;  %v421_v61 = vsub.f32 0.0, %v420_v59 }
 0x16d   : > { %913 = vrcp.f32 %v408_v58  ;;  %v422_v0 = vmul.f32 1.442695, %v421_v61 }
 0x16f   : > { %915 = vpow2.f32 %v422_v0 }
 0x177   : > { %v914_v60 = vpop.eup %913 }
 0x178   : > { %v411_v62 = vmul.f32 1.0614054, %v914_v60 }
 0x179   : > { %v916_v8 = vpop.eup %915 }
 0x17a   : > { %v412_v63 = vadd.f32 -1.4531521, %v411_v62 }
 0x17c   : > { %v413_v1 = vmul.f32 %v914_v60, %v412_v63 }
 0x17e   : > { %v414_v2 = vadd.f32 1.4214138, %v413_v1 }
 0x180   : > { %v415_v3 = vmul.f32 %v914_v60, %v414_v2 }
 0x182   : > { %v416_v4 = vadd.f32 -0.28449672, %v415_v3 }
 0x184   : > { %v417_v5 = vmul.f32 %v914_v60, %v416_v4 }
 0x186   : > { %v418_v6 = vadd.f32 0.2548296, %v417_v5 }
 0x188   : > { %v419_v7 = vmul.f32 %v914_v60, %v418_v6 }
 0x18a   : > { %v424_v9 = vmul.f32 %v916_v8, %v419_v7 }
 0x18c   : > { %v425_v10 = vsub.f32 1.0, %v424_v9 }
 0x18e   : > { %v427_v11 = vsub.f32 0.0, %v425_v10 }
 0x190   : > { %v428_v12 = vsel %vm426_vm1, %v427_v11, %v425_v10 }
 0x191   : > { %v429_v13 = vadd.f32 1.0, %v428_v12 }
 0x193   : > { %v430_v14 = vmul.f32 0.5, %v429_v13 }
 0x195   : > { %v431_v15 = vmul.f32 %v430_v14, %v402_v53 }
 0x197   : > { %775 = vmatmul.mubr.f32.vlgmr.msra.gmra.mrb[0].mxu1 %v431_v15 }
 0x26a   : > { %v521_v17 = vpop.f32.mrb[0].mxu1 }
 0x26b   : > { %v522_v18 = vadd.f32 %v668_v16, %v521_v17  ;;  %v776_v19 = vpop.f32.mrb[1].mxu1 }
 0x26d   : > { %525 = vst [vmem:[%s306_s9] sm:$0xff] %v522_v18 }
 0x26e   : > { %1016 = shalt.err (!%p1013_p11)
}
 0x26f   : > { %s1017_s13 = scalar_lea.hbm %s1360_s14, 128  ;;  %s1021_s30 = scalar_lea.hbm %s1414_s5, 256 }
 0x270   : > { %p1018_p0 = scmp.ne.s32.totalorder %s1360_s14, %s1017_s13  ;;  %p1022_p6 = scmp.lt.u32.totalorder %s1360_s14, %s1414_s5 }
 0x271   : > { %p1023_p7 = scmp.lt.u32.totalorder %s1021_s30, %s1017_s13  ;;  %p1025_p8 = scmp.lt.u32.totalorder %s1017_s13, %s1360_s14 }
 0x272   : > { %p1019_p4 = pnand %p1018_p0, %p1429_p12 }
 0x273   : > { %p1024_p2 = por %p1023_p7, %p1022_p6 }
 0x274   : > { %p1020_p13 = pneg %p1019_p4 }
 0x275   : > { %p1026_p1 = por %p1025_p8, %p1024_p2 }
 0x277   : > { %p1027_p10 = pnand %p1026_p1, %p1020_p13 }
 0x279   : > { %1030 = shalt.err (!%p1027_p10)
}
 0x27a   : > { %835 = dma.vmem_to_hbm [thread:$0]  (%p1429_p12), %s1362_s11, 128, %s1360_s14, %s527_s10  }
 0x27b PF: > { %s552_s9 = sand.u32 1, %s1069_s18   ;;  %p1430_p3 = scmp.ne.s32.totalorder %s1422_s29, 0 }
 0x27c   : > { %p1431_p5 = scmp.ge.s32.totalorder %s1089_s23, 2  ;;  %s553_s15 = scalar_lea.sflag [#allocation4], %s552_s9 }
 0x27e   : > { %p849_p9 = pnand %p1431_p5, %p1430_p3 }
 0x280   : > { %1064 = dma.done.wait (!%p849_p9), %s553_s15, 128  }
 0x281   : > { %1066 = vsyncadd (!%p849_p9), %s553_s15, 4294967168  ;;  %s22_s23 = sadd.s32 1, %s1089_s23   ;;  %s1432_s18 = smov %s1073_s19 }
 0x282   : > { %p19_p11 = scmp.ge.s32.totalorder %s22_s23, 4   ;;  %s1433_s19 = smov %s1077_s20 }
 0x283   : > { %s1434_s20 = smov %s1272_s6  ;;  %s1435_s21 = smov %s1085_s22 }
 0x284   : > { %s1436_s22 = smov %s1438_s12  ;;  %21 = sbr.rel (!%p19_p11) target bundleno = 7 (0x7), region = 98 }
 0x28b   :  { %558 = vsyncpa [#allocation3], 1 }
 0x28c   :  { %560 = vsyncpa [#allocation3 + $0x1], 1 }
 0x28d   :  { %561 = vsyncpa [#allocation6], 1 }
 0x28e   :  { %562 = vsyncpa [#allocation4], 1 }
 0x28f   :  { %564 = vsyncpa [#allocation4 + $0x1], 1 }

</bundles_post_ra>
